<compile_context>
chip_gen: v7x
topology: tpu7x:2x2x1
jax: 0.10.0
libtpu: 0.0.40
codegen_flags: <defaults>
</compile_context>

<pallas_src>
import jax
import jax.numpy as jnp
import numpy as np
from jax.experimental import pallas as pl
from jax.experimental.pallas import tpu as pltpu


def _round_up(x, m):
  return ((x + m - 1) // m) * m


def _complex_convtranspose1d_kernel(x_ref, w_ref, b_ref, o_ref):
  # x_ref : (R_in, L_tile)  bf16 polyphase im2col columns ([real|imag] x K taps)
  # w_ref : (R_out, R_in)   bf16 packed complex block weights
  # b_ref : (R_out, 1)      f32  [b_r - b_i ; b_r + b_i]
  # o_ref : (R_out, L_tile) f32  [real ; imag] output rows, sequence on lanes
  o_ref[...] = (jnp.dot(w_ref[...], x_ref[...],
                        preferred_element_type=jnp.float32) + b_ref[...])


def complex_conv_transpose1d(x_real, x_imag, w_r, w_i, b_r, b_i,
                             stride=1, padding=0, output_padding=0, dilation=1,
                             l_tile_target=2048, compute_dtype=jnp.bfloat16):
  N, C_in, L = x_real.shape
  C_in_w, C_out, K = w_r.shape
  assert C_in_w == C_in
  L_out = (L - 1) * stride - 2 * padding + dilation * (K - 1) + output_padding + 1

  # --- pad channel counts so packed row counts are sublane(8)-aligned ---------
  C_in_p = C_in
  while (2 * C_in_p * K) % 8:
    C_in_p += 1
  C_out_p = _round_up(C_out, 4)                 # 2*C_out_p is a multiple of 8
  R_in, R_out = 2 * C_in_p * K, 2 * C_out_p
  itm = np.dtype(compute_dtype).itemsize

  if C_in_p != C_in:
    zx = jnp.zeros((N, C_in_p - C_in, L), x_real.dtype)
    x_real = jnp.concatenate([x_real, zx], axis=1)
    x_imag = jnp.concatenate([x_imag, zx], axis=1)
    zw = jnp.zeros((C_in_p - C_in, C_out, K), w_r.dtype)
    w_r = jnp.concatenate([w_r, zw], axis=0)
    w_i = jnp.concatenate([w_i, zw], axis=0)
  if C_out_p != C_out:
    zw = jnp.zeros((C_in_p, C_out_p - C_out, K), w_r.dtype)
    w_r = jnp.concatenate([w_r, zw], axis=1)
    w_i = jnp.concatenate([w_i, zw], axis=1)
    zb = jnp.zeros((C_out_p - C_out,), b_r.dtype)
    b_r = jnp.concatenate([b_r, zb])
    b_i = jnp.concatenate([b_i, zb])

  # --- pick a lane-dense sequence tile (multiple of 128) ----------------------
  L_tile = min(l_tile_target, _round_up(L_out, 128))

  def vmem_bytes(lt):
    return (2 * R_in * lt * itm            # double-buffered bf16 x tile
            + 2 * R_out * lt * 4           # double-buffered f32 out tile
            + 2 * R_out * R_in * itm       # weights (double-buffered worst case)
            + 2 * R_out * 4)               # bias

  # stay well inside v7x's 64 MiB physical VMEM (32 MiB scoped default)
  while vmem_bytes(L_tile) > 24 * 1024 * 1024 and L_tile > 128:
    L_tile = max(128, _round_up(L_tile // 2, 128))

  L_pad = _round_up(L_out, L_tile)
  num_tiles = N * (L_pad // L_tile)
  # feed both v7x TensorCores: aim for >= 4 parallel grid steps when possible
  while num_tiles < 4 and L_tile > 128:
    L_tile = max(128, _round_up(L_tile // 2, 128))
    L_pad = _round_up(L_out, L_tile)
    num_tiles = N * (L_pad // L_tile)

  # ------------- polyphase im2col (plain JAX gather, single pass) -------------
  # out[n, :, t] = bias + sum_k W_k @ x[n, :, (t + padding - k*dilation)/stride]
  # Invalid taps (non-integer / out of range / t >= L_out) read a zero column.
  x2 = jnp.concatenate([x_real, x_imag], axis=1)            # (N, 2*C_in_p, L)
  x2 = jnp.transpose(x2, (1, 0, 2))                         # (2*C_in_p, N, L)
  x2 = jnp.concatenate(
      [x2, jnp.zeros((2 * C_in_p, N, 1), x2.dtype)], axis=2)  # zero col at L
  x2 = x2.reshape(2 * C_in_p, N * (L + 1)).astype(compute_dtype)

  t_idx = jnp.arange(L_pad)
  k_idx = jnp.arange(K)
  num = t_idx[None, :] + padding - k_idx[:, None] * dilation  # (K, L_pad)
  valid = ((num >= 0) & (num % stride == 0)
           & (num // stride < L) & (t_idx[None, :] < L_out))
  l_idx = jnp.where(valid, num // stride, L)                  # L -> zero column
  g_idx = (jnp.arange(N)[None, :, None] * (L + 1)
           + l_idx[:, None, :]).reshape(K, N * L_pad)
  x_col = jnp.take(x2, g_idx, axis=1)                     # (2*C_in_p, K, N*L_pad)
  x_col = x_col.reshape(R_in, N * L_pad)                  # row index = c*K + k

  # ------------- pack complex block weights: one matmul does it all -----------
  #   [ wr  -wi ]   rows 0..C_out_p      -> real out
  #   [ wi   wr ]   rows C_out_p..R_out  -> imag out
  wrT = jnp.transpose(w_r, (1, 0, 2))                     # (C_out_p, C_in_p, K)
  wiT = jnp.transpose(w_i, (1, 0, 2))
  w_big = jnp.concatenate(
      [jnp.concatenate([wrT, -wiT], axis=1),
       jnp.concatenate([wiT, wrT], axis=1)],
      axis=0).reshape(R_out, R_in).astype(compute_dtype)  # col index = c*K + k

  bias2 = jnp.concatenate([b_r - b_i, b_r + b_i]).reshape(R_out, 1)
  bias2 = bias2.astype(jnp.float32)

  cost = pl.CostEstimate(
      flops=2 * R_out * R_in * N * L_pad,
      transcendentals=0,
      bytes_accessed=(R_in * N * L_pad * itm + R_out * R_in * itm
                      + R_out * 4 + R_out * N * L_pad * 4))

  out = pl.pallas_call(
      _complex_convtranspose1d_kernel,
      out_shape=jax.ShapeDtypeStruct((R_out, N * L_pad), jnp.float32),
      grid=(num_tiles,),
      in_specs=[
          pl.BlockSpec((R_in, L_tile), lambda j: (0, j)),
          pl.BlockSpec((R_out, R_in), lambda j: (0, 0)),
          pl.BlockSpec((R_out, 1), lambda j: (0, 0)),
      ],
      out_specs=pl.BlockSpec((R_out, L_tile), lambda j: (0, j)),
      compiler_params=pltpu.CompilerParams(
          dimension_semantics=("parallel",),
          vmem_limit_bytes=32 * 1024 * 1024),
      cost_estimate=cost,
  )(x_col, w_big, bias2)

  # Unpack: rows [0:C_out] real, [C_out_p:C_out_p+C_out] imag; drop L padding.
  out = out.reshape(R_out, N, L_pad)[:, :, :L_out]
  res = (out[:C_out] + 1j * out[C_out_p:C_out_p + C_out]).astype(jnp.complex64)
  return jnp.transpose(res, (1, 0, 2))                    # (N, C_out, L_out)


def _conv_transpose1d_ref(x, w, b, stride, padding, output_padding, dilation):
  """Naive numpy reference matching torch.nn.ConvTranspose1d (groups=1)."""
  N, Cin, L = x.shape
  _, Cout, K = w.shape
  L_out = (L - 1) * stride - 2 * padding + dilation * (K - 1) + output_padding + 1
  out = np.zeros((N, Cout, L_out), np.float32)
  for l in range(L):
    for k in range(K):
      t = l * stride - padding + k * dilation
      if 0 <= t < L_out:
        out[:, :, t] += x[:, :, l] @ w[:, :, k]
  return out + b[None, :, None]


def _run_case(key, N, C_in, C_out, L, K, stride, padding, output_padding, dilation):
  k1, k2, k3, k4, k5, k6 = jax.random.split(key, 6)
  x_real = jax.random.normal(k1, (N, C_in, L), jnp.float32)
  x_imag = jax.random.normal(k2, (N, C_in, L), jnp.float32)
  # ConvTranspose1d weight shape: (in_channels, out_channels, kernel_size)
  w_r = 0.1 * jax.random.normal(k3, (C_in, C_out, K), jnp.float32)
  w_i = 0.1 * jax.random.normal(k4, (C_in, C_out, K), jnp.float32)
  b_r = 0.1 * jax.random.normal(k5, (C_out,), jnp.float32)
  b_i = 0.1 * jax.random.normal(k6, (C_out,), jnp.float32)

  out = complex_conv_transpose1d(x_real, x_imag, w_r, w_i, b_r, b_i,
                                 stride, padding, output_padding, dilation)
  out = jax.block_until_ready(out)

  # Reference with the same bf16 rounding of the streamed operands; the kernel
  # accumulates in f32 on the MXU, so only input quantization differs.
  q = lambda a: np.asarray(jnp.asarray(a).astype(jnp.bfloat16).astype(jnp.float32))
  xr, xi, wr, wi = q(x_real), q(x_imag), q(w_r), q(w_i)
  br, bi = np.asarray(b_r), np.asarray(b_i)
  conv_r = lambda z: _conv_transpose1d_ref(z, wr, br, stride, padding,
                                           output_padding, dilation)
  conv_i = lambda z: _conv_transpose1d_ref(z, wi, bi, stride, padding,
                                           output_padding, dilation)
  ref = (conv_r(xr) - conv_i(xi)) + 1j * (conv_r(xi) + conv_i(xr))

  assert out.shape == ref.shape, (out.shape, ref.shape)
  np.testing.assert_allclose(np.asarray(out.real), ref.real, rtol=1e-4, atol=1e-4)
  np.testing.assert_allclose(np.asarray(out.imag), ref.imag, rtol=1e-4, atol=1e-4)


if __name__ == "__main__":
  root = jax.random.PRNGKey(0)
  key1, key2 = jax.random.split(root)

  # Small config matching the module defaults-ish shapes.
  _run_case(key1, N=2, C_in=4, C_out=6, L=8, K=3,
            stride=2, padding=1, output_padding=1, dilation=1)

  # Longer sequence, odd channel counts, stride/dilation/padding all nontrivial
  # (exercises channel padding, the zero-column gather, and multi-tile grid).
  _run_case(key2, N=2, C_in=3, C_out=5, L=300, K=3,
            stride=3, padding=2, output_padding=2, dilation=2)

  print("KERNEL_OK")
</pallas_src>

<mosaic_0001>
module attributes {stable_mosaic.version = 11 : i64} {
  func.func @_complex_convtranspose1d_kernel(%arg0: i32, %arg1: memref<24x128xbf16, #tpu.memory_space<vmem>>, %arg2: memref<16x24xbf16, #tpu.memory_space<vmem>>, %arg3: memref<16x1xf32, #tpu.memory_space<vmem>>, %arg4: memref<16x128xf32, #tpu.memory_space<vmem>>) attributes {dimension_semantics = [#tpu.dimension_semantics<parallel>], iteration_bounds = array<i64: 2>, scalar_prefetch = 0 : i64, scratch_operands = 0 : i64, tpu.core_type = #tpu.core_type<tc>, window_params = [{transform_indices = @transform_0, window_bounds = array<i64: 24, 128>}, {pipeline_mode = #tpu.pipeline_mode<synchronous>, transform_indices = @transform_1, window_bounds = array<i64: 16, 24>}, {pipeline_mode = #tpu.pipeline_mode<synchronous>, transform_indices = @transform_2, window_bounds = array<i64: 16, 1>}, {transform_indices = @transform_3, window_bounds = array<i64: 16, 128>}]} {
    %c0 = arith.constant 0 : index
    %c0_0 = arith.constant 0 : index
    %0 = vector.load %arg2[%c0, %c0_0] : memref<16x24xbf16, #tpu.memory_space<vmem>>, vector<16x24xbf16>
    %c0_1 = arith.constant 0 : index
    %c0_2 = arith.constant 0 : index
    %1 = vector.load %arg1[%c0_1, %c0_2] : memref<24x128xbf16, #tpu.memory_space<vmem>>, vector<24x128xbf16>
    %cst = arith.constant dense<0.000000e+00> : vector<16x128xf32>
    %2 = tpu.matmul %0, %1, %cst {dimension_numbers = #tpu.dot_dimension_numbers<[1], [0], [0], [1], [0, 0, 1, 1], [], []>} : vector<16x24xbf16>, vector<24x128xbf16>, vector<16x128xf32> -> vector<16x128xf32>
    %c0_3 = arith.constant 0 : index
    %c0_4 = arith.constant 0 : index
    %3 = vector.load %arg3[%c0_3, %c0_4] : memref<16x1xf32, #tpu.memory_space<vmem>>, vector<16x1xf32>
    %4 = vector.broadcast %3 : vector<16x1xf32> to vector<16x128xf32>
    %5 = arith.addf %2, %4 : vector<16x128xf32>
    %c0_5 = arith.constant 0 : index
    %c0_6 = arith.constant 0 : index
    %6 = vector.load %arg4[%c0_5, %c0_6] : memref<16x128xf32, #tpu.memory_space<vmem>>, vector<16x128xf32>
    tpu.vector_store %arg4[%c0_5, %c0_6], %5 {strides = array<i32>} : memref<16x128xf32, #tpu.memory_space<vmem>>, vector<16x128xf32>,
    return
  }
  func.func @transform_0(%arg0: i32) -> (i32, i32) {
    %c0_i32 = arith.constant 0 : i32
    %c0_i32_0 = arith.constant 0 : i32
    return %c0_i32, %arg0 : i32, i32
  }
  func.func @transform_1(%arg0: i32) -> (i32, i32) {
    %c0_i32 = arith.constant 0 : i32
    %c0_i32_0 = arith.constant 0 : i32
    %c0_i32_1 = arith.constant 0 : i32
    return %c0_i32, %c0_i32_0 : i32, i32
  }
  func.func @transform_2(%arg0: i32) -> (i32, i32) {
    %c0_i32 = arith.constant 0 : i32
    %c0_i32_0 = arith.constant 0 : i32
    %c0_i32_1 = arith.constant 0 : i32
    return %c0_i32, %c0_i32_0 : i32, i32
  }
  func.func @transform_3(%arg0: i32) -> (i32, i32) {
    %c0_i32 = arith.constant 0 : i32
    %c0_i32_0 = arith.constant 0 : i32
    return %c0_i32, %arg0 : i32, i32
  }
}

</mosaic_0001>

<bundles_post_ra>
// kernel: tpu_custom_call.1
= control target key start
LH: loop header
LB: loop body
LE: loop exit
PB: predicated region body
PF: predicated region fallthrough
CT: control target
= control target key end

     0   :  { %8 = vsyncpa [#allocation3], 0  ;;  %s740_s0 = inlined_call_operand.hbm [shape: bf16[24,256], index: 0, kind: input, shape index: {}]   ;;  %s741_s1 = inlined_call_operand.vmem [shape: bf16[16,24], index: 1, kind: input, shape index: {}]   ;;  %s742_s2 = inlined_call_operand.vmem [shape: f32[16,1], index: 2, kind: input, shape index: {}]   ;;  %s743_s3 = inlined_call_operand.hbm [shape: f32[16,256], index: 3, kind: output, shape index: {}]  }
   0x1   :  { %10 = vsyncpa [#allocation3 + $0x1], 0 }
   0x2   :  { %11 = vsyncpa [#allocation4], 0 }
   0x3   :  { %13 = vsyncpa [#allocation4 + $0x1], 0  ;;  %s572_s12 = smov 0   ;;  %s574_s13 = smov 0  }
   0x4   :  { %s576_s14 = smov 0   ;;  %s578_s15 = smov 0  }
   0x5 LB: > { %s593_s16 = sadd.s32 4294967295, %s539_s15   ;;  %s357_s17 = sadd.s32 4294967294, %s539_s15   ;;  %s539_s15 = sphi %s578_s15, %s756_s15   ;;  %s535_s14 = sphi %s576_s14, %s755_s14   ;;  %s531_s13 = sphi %s574_s13, %s754_s13   ;;  %s527_s12 = sphi %s572_s12, %s753_s12  }
   0x6   : > { %s597_s18 = sadd.s32 1, %s539_s15   ;;  %s26_s19 = sadd.s32 1, %s535_s14 }
   0x7   : > { %s23_s20 = ssub.s32 %s539_s15, %s597_s18  ;;  %p33_p0 = scmp.ne.s32.totalorder %s535_s14, %s531_s13 }
   0x8   : > { %p24_p1 = scmp.eq.s32.totalorder %s23_s20, 0  ;;  %p34_p2 = scmp.eq.s32.totalorder %s539_s15, 0 }
   0x9   : > { %p39_p3 = scmp.ne.s32.totalorder %s531_s13, %s527_s12  ;;  %p40_p4 = scmp.eq.s32.totalorder %s593_s16, 0 }
   0xa   : > { %s609_s21 = scalar_select %p24_p1, %s535_s14, %s26_s19  }
   0xb   : > { %p35_p5 = por %p34_p2, %p33_p0  ;;  %p611_p6 = por %p40_p4, %p39_p3 }
   0xc   : > { %p105_p7 = scmp.eq.s32.totalorder %s593_s16, 1  ;;  %p111_p8 = scmp.eq.s32.totalorder %s357_s17, 1 }
   0xd   : > { %p396_p10 = scmp.lt.s32.totalorder %s539_s15, 2  ;;  %s137_s25 = sand.u32 1, %s535_s14  }
   0xe   : > { %p618_p11 = por %p105_p7, %p33_p0  ;;  %p622_p12 = por %p111_p8, %p39_p3 }
   0xf   : > { %s360_s26 = sshll.u32 %s539_s15, 6  ;;  %s382_s27 = smul.u32 12, %s137_s25 }
  0x10   : > { %s746_s23 = scalar_select %p618_p11, 1, 0 }
  0x11   : > { %s747_s24 = scalar_select %p622_p12, 1, 0 }
  0x12   : > { %s631_s30 = scalar_lea.hbm %s740_s0, %s360_s26  ;;  %p633_p13 = pnand %p396_p10, %p35_p5 }
  0x13   : > { %s141_s5 = scalar_lea.vmem [#allocation2], %s382_s27  ;;  %s640_s7 = scalar_lea.sflag [#allocation3], %s137_s25 }
  0x14   : > { %s147_s6 = sshll.u32 %s141_s5, 4  ;;  %s443_s8 = scalar_lea.hbm %s631_s30, 192  ;;  %s637_s6 = int_to_ptr.vmem [resolvable:$true] %s147_s6 }
  0x15   : > { %p444_p1 = scmp.ne.s32.totalorder %s631_s30, %s443_s8  ;;  %p445_p2 = pneg %p633_p13 }
  0x16   : > { %s448_s11 = scalar_lea.hbm %s740_s0, 384  ;;  %p449_p5 = scmp.lt.u32.totalorder %s631_s30, %s740_s0 }
  0x17   : > { %p446_p3 = pnand %p445_p2, %p444_p1  ;;  %p450_p7 = scmp.lt.u32.totalorder %s448_s11, %s443_s8 }
  0x18   : > { %p452_p10 = scmp.lt.u32.totalorder %s443_s8, %s631_s30 }
  0x19   : > { %p447_p4 = pneg %p446_p3  ;;  %p451_p8 = por %p450_p7, %p449_p5 }
  0x1b   : > { %p453_p9 = por %p452_p10, %p451_p8 }
  0x1d   : > { %p454_p0 = pnand %p453_p9, %p447_p4 }
  0x1f   : > { %457 = shalt.err (!%p454_p0)
}
  0x20   : > { %s458_s20 = scalar_lea.vmem %s637_s6, 192  ;;  %s541_s25 = smov [#allocation2]  }
  0x21   : > { %p459_p1 = scmp.ne.s32.totalorder %s637_s6, %s458_s20  ;;  %s463_s26 = sshll.u32 %s541_s25, 4  ;;  %s464_s26 = int_to_ptr.vmem [resolvable:$false] %s463_s26 }
  0x22   : > { %s465_s27 = scalar_lea.vmem %s464_s26, 384  ;;  %p466_p11 = scmp.lt.s32.totalorder %s637_s6, %s464_s26 }
  0x23   : > { %p461_p3 = pnand %p459_p1, %p445_p2  ;;  %p467_p5 = scmp.lt.s32.totalorder %s465_s27, %s458_s20 }
  0x25   : > { %p462_p12 = pneg %p461_p3  ;;  %p468_p7 = por %p467_p5, %p466_p11 }
  0x27   : > { %p469_p8 = pnand %p468_p7, %p462_p12 }
  0x29   : > { %472 = shalt.err (!%p469_p8)
}
  0x2a   : > { %s542_s28 = smov 128   ;;  %s543_s29 = smov 64  }
  0x2b   : > { %s544_s5 = smov 4   ;;  %p155_p9 = scmp.lt.s32.totalorder %s539_s15, 3 }
  0x2c   : > { %391 = dma.hbm_to_vmem [thread:$0]  (!%p633_p13), %s631_s30, 192, %s637_s6, %s640_s7, %s542_s28, %s543_s29, %s544_s5  }
  0x2d   : > { %p749_p0 = scmp.ge.s32.totalorder %s539_s15, 1 }
  0x2f   : > { %p156_p2 = pnand %p749_p0, %p155_p9 }
  0x30   : > { %s672_s8 = sand.u32 (!%p156_p2), 1, %s531_s13  }
  0x31   : > { %159 = sbr.rel (%p156_p2) target bundleno = 298 (0x12a), region = 32  ;;  %s162_s10 = scalar_lea.sflag (!%p156_p2), [#allocation3], %s672_s8 }
  0x32   : > { %s383_s9 = smul.u32 (!%p156_p2), 12, %s672_s8 }
  0x34   : > { %s165_s11 = scalar_lea.vmem (!%p156_p2), [#allocation2], %s383_s9 }
  0x38   : > { %518 = dma.done.wait (%p611_p6), %s162_s10, 192  }
  0x39   : > { %520 = vsyncadd (%p611_p6), %s162_s10, 4294967104  ;;  %v545_v0 = vmov 0.0   ;;  %vm546_vm0 = vmmov 0   ;;  %v547_v1 = vmov 0   ;;  %v440_v2 = vld [vmem:[%s165_s11] sm:$0xff]   ;;  %vm224_vm1 = vcmask 1043456  }
  0x3a   : > { %374 = vmatprep.subr.bf16.mxu0 %v545_v0  ;;  %378 = vmatprep.mubr.msk.bf16.mxu0 %vm546_vm0, %v545_v0  ;;  %v441_v3 = vld [vmem:[%s165_s11 + $0x8] ss:$0 sps:$4 sm:$0xff]   ;;  %v194_v4 = vld [vmem:[%s742_s2] sm:$0xff]  ;;  %vm220_vm2 = vcmask 195584   ;;  %s362_s19 = sshll.u32 %s672_s8, 4  ;;  %s368_s26 = sshll.u32 %s593_s16, 7 }
  0x3b   : > { %439 = vset.pattern.permute.xlu0 %v547_v1  ;;  %375 = vmatpush3.bf16.msra.mxu0 %v440_v2  ;;  %v226_v5 = vsel %vm224_vm1, %v441_v3, 0  ;;  %v195_v6 = vld [vmem:[%s742_s2 + $0x8] sm:$0xff]  ;;  %v442_v7 = vld [vmem:[%s741_s1] sm:$0xff]   ;;  %s187_s20 = scalar_lea.vmem [#allocation5], %s362_s19  ;;  %s696_s29 = scalar_lea.hbm %s743_s3, %s368_s26 }
  0x3c   : > { %376 = vmatprep.subr.bf16.mxu0 %v545_v0  ;;  %198 = vperm.xlu0 %439, %v194_v4   ;;  %s284_s25 = sshll.u32 %s187_s20, 4  ;;  %s272_s16 = scalar_lea.sflag [#allocation4], %s672_s8  ;;  %s691_s25 = int_to_ptr.vmem [resolvable:$true] %s284_s25 }
  0x3d   : > { %s473_s5 = scalar_lea.vmem %s691_s25, 256  ;;  %p750_p11 = scmp.ne.s32.totalorder %s746_s23, 0 }
  0x3e   : > { %p474_p6 = scmp.ne.s32.totalorder %s691_s25, %s473_s5  ;;  %s548_s9 = smov [#allocation5]  }
  0x3f   : > { %377 = vmatpush3.bf16.msra.mxu0 %v226_v5  ;;  %s477_s10 = sshll.u32 %s548_s9, 4  ;;  %s478_s10 = int_to_ptr.vmem [resolvable:$false] %s477_s10 }
  0x40   : > { %203 = vperm.xlu0 %439, %v195_v6   ;;  %p475_p12 = pnand %p474_p6, %p750_p11  ;;  %s479_s11 = scalar_lea.vmem %s478_s10, 512 }
  0x41   : > { %p480_p4 = scmp.lt.s32.totalorder %s691_s25, %s478_s10  ;;  %p481_p10 = scmp.lt.s32.totalorder %s479_s11, %s473_s5 }
  0x42   : > { %379 = vmatmul.mubr.msk.bf16.vlgmr.msra.gmra.mrb[0].mxu0 %vm220_vm2, %v442_v7  ;;  %p476_p13 = pneg %p475_p12 }
  0x43   : > { %p482_p1 = por %p481_p10, %p480_p4 }
  0x45   : > { %p483_p3 = pnand %p482_p1, %p476_p13 }
  0xbb   : > { %v199_v8 = vpop.permute.xlu0 %198 }
  0xbf   : > { %v204_v12 = vpop.permute.xlu0 %203 }
 0x115   : > { %v262_v9 = vpop.f32.mrb[0].mxu0 }
 0x116   : > { %v263_v10 = vadd.f32 %v262_v9, %v199_v8  ;;  %v380_v11 = vpop.f32.mrb[1].mxu0 }
 0x117   : > { %v265_v13 = vpop.f32.mrb[2].mxu0 }
 0x118   : > { %269 = vst [vmem:[%s187_s20] sm:$0xff] %v263_v10  ;;  %v266_v14 = vadd.f32 %v265_v13, %v204_v12  ;;  %v381_v15 = vpop.f32.mrb[3].mxu0 }
 0x11a   : > { %270 = vst [vmem:[%s187_s20 + $0x8] sm:$0xff] %v266_v14 }
 0x11b   : > { %486 = shalt.err (!%p483_p3)
}
 0x11c   : > { %s487_s30 = scalar_lea.hbm %s696_s29, 256  ;;  %s491_s6 = scalar_lea.hbm %s743_s3, 512 }
 0x11d   : > { %p488_p5 = scmp.ne.s32.totalorder %s696_s29, %s487_s30  ;;  %p492_p9 = scmp.lt.u32.totalorder %s696_s29, %s743_s3 }
 0x11e   : > { %p493_p0 = scmp.lt.u32.totalorder %s491_s6, %s487_s30  ;;  %p495_p6 = scmp.lt.u32.totalorder %s487_s30, %s696_s29 }
 0x11f   : > { %p489_p7 = pnand %p488_p5, %p750_p11 }
 0x120   : > { %p494_p2 = por %p493_p0, %p492_p9 }
 0x121   : > { %p490_p8 = pneg %p489_p7 }
 0x122   : > { %p496_p12 = por %p495_p6, %p494_p2 }
 0x124   : > { %p497_p13 = pnand %p496_p12, %p490_p8 }
 0x126   : > { %500 = shalt.err (!%p497_p13)
}
 0x127   : > { %s549_s19 = smov 128   ;;  %s550_s20 = smov 256  }
 0x128   : > { %s551_s26 = smov 8  }
 0x129   : > { %386 = dma.vmem_to_hbm [thread:$0]  (%p750_p11), %s691_s25, 256, %s696_s29, %s272_s16, %s549_s19, %s550_s20, %s551_s26  }
 0x12a PF: > { %s299_s27 = sand.u32 1, %s527_s12   ;;  %p751_p4 = scmp.ne.s32.totalorder %s747_s24, 0 }
 0x12b   : > { %p752_p10 = scmp.ge.s32.totalorder %s539_s15, 2  ;;  %s300_s28 = scalar_lea.sflag [#allocation4], %s299_s27 }
 0x12d   : > { %p393_p1 = pnand %p752_p10, %p751_p4 }
 0x12f   : > { %522 = dma.done.wait (!%p393_p1), %s300_s28, 256  }
 0x130   : > { %524 = vsyncadd (!%p393_p1), %s300_s28, 4294967040  ;;  %p16_p3 = scmp.ge.s32.totalorder %s597_s18, 4   ;;  %s753_s12 = smov %s531_s13 }
 0x131   : > { %s754_s13 = smov %s535_s14  ;;  %s755_s14 = smov %s609_s21 }
 0x132   : > { %s756_s15 = smov %s597_s18  ;;  %18 = sbr.rel (!%p16_p3) target bundleno = 5 (0x5), region = 77 }
 0x139   :  { %305 = vsyncpa [#allocation3], 1 }
 0x13a   :  { %307 = vsyncpa [#allocation3 + $0x1], 1 }
 0x13b   :  { %308 = vsyncpa [#allocation4], 1 }
 0x13c   :  { %310 = vsyncpa [#allocation4 + $0x1], 1 }

</bundles_post_ra>
